<compile_context>
chip_gen: v7x
topology: tpu7x:2x2x1
jax: 0.10.0
libtpu: 0.0.40
codegen_flags: <defaults>
</compile_context>

<pallas_src>
import jax
import jax.numpy as jnp
from jax.experimental import pallas as pl
from jax.experimental.pallas import tpu as pltpu


def lam_gconv_kernel(a_ref, x_ref, w_ref, b_ref, o_ref):
    # a: (N, N)  x: (TB, N, F_in)  w: (F_in, F_pad)  b: (1, F_pad)
    # o: (TB*N, F_pad)
    TB, N, F_in = x_ref.shape

    A = a_ref[...].astype(jnp.float32)

    # Normalized Laplacian, built once per grid step (A is shared across the
    # whole batch block).  Stay 2-D throughout; rsqrt runs on the EUP slot.
    col_sum = jnp.sum(A, axis=0, keepdims=True)             # (1, N) == torch.sum(A_hat, 1)
    d = jax.lax.rsqrt(col_sum + 1e-5)                       # (1, N)
    L = (jnp.transpose(d) * A) * d                          # (N, N): d[i]*A[i,j]*d[j]

    X = x_ref[...].astype(jnp.float32)                      # (TB, N, F_in)

    # Batched graph mixing on the MXU: Y[b] = L @ X[b].
    Lb = jnp.broadcast_to(L, (TB, N, N))
    Y = jnp.einsum("bij,bjf->bif", Lb, X,
                   preferred_element_type=jnp.float32)      # (TB, N, F_in)

    # Flattened fc: one tall-M matmul, fused bias + ReLU, lane-dense output.
    Y2 = Y.reshape(TB * N, F_in)
    Z = jnp.dot(Y2, w_ref[...].astype(jnp.float32),
                preferred_element_type=jnp.float32)
    Z = Z + b_ref[...].astype(jnp.float32)
    o_ref[...] = jnp.maximum(Z, 0.0).astype(o_ref.dtype)


def _round_up(x, m):
    return (x + m - 1) // m * m


def _pick_batch_block(B, N):
    # Aim for a tall flattened-fc M dimension while keeping VMEM blocks modest;
    # require TB to divide B so every grid step is a full block.
    tb = max(1, min(B, 1024 // max(N, 1)))
    while B % tb:
        tb -= 1
    return tb


def lam_gconv(X, A, W, b):
    """X: [B, N, F_in], A: [N, N], W: [F_in, F_out], b: [F_out] -> [B, N, F_out]."""
    B, N, F_in = X.shape
    F_out = W.shape[1]
    F_pad = _round_up(F_out, 128)

    # Zero-pad fc params so the kernel's output block has a 128-dense lane dim.
    W_pad = jnp.pad(W, ((0, 0), (0, F_pad - F_out)))
    b_pad = jnp.pad(b.reshape(1, F_out), ((0, 0), (0, F_pad - F_out)))

    TB = _pick_batch_block(B, N)
    grid = (B // TB,)

    out_flat = pl.pallas_call(
        lam_gconv_kernel,
        out_shape=jax.ShapeDtypeStruct((B * N, F_pad), X.dtype),
        grid_spec=pltpu.PrefetchScalarGridSpec(
            num_scalar_prefetch=0,
            grid=grid,
            in_specs=[
                pl.BlockSpec((N, N), lambda i: (0, 0)),            # A (shared)
                pl.BlockSpec((TB, N, F_in), lambda i: (i, 0, 0)),  # X batch block
                pl.BlockSpec((F_in, F_pad), lambda i: (0, 0)),     # W (shared, padded)
                pl.BlockSpec((1, F_pad), lambda i: (0, 0)),        # bias (shared, padded)
            ],
            out_specs=pl.BlockSpec((TB * N, F_pad), lambda i: (i, 0)),
        ),
        compiler_params=pltpu.CompilerParams(
            dimension_semantics=("parallel",),
            vmem_limit_bytes=32 * 1024 * 1024,
        ),
    )(A, X, W_pad, b_pad)

    # Undo the flattening / lane padding (cheap wrapper-side reshape + slice).
    return out_flat.reshape(B, N, F_pad)[..., :F_out]


def lam_gconv_ref(X, A, W, b):
    """Pure-JAX reference mirroring the PyTorch forward exactly."""
    Bt = X.shape[0]
    A_hat = jnp.broadcast_to(A[None], (Bt,) + A.shape)
    D_hat = (jnp.sum(A_hat, axis=1) + 1e-5) ** -0.5
    L = D_hat[:, :, None] * A_hat * D_hat[:, None, :]
    Y = jnp.einsum("bij,bjf->bif", L, X)
    Z = jnp.einsum("bif,fo->bio", Y, W) + b
    return jnp.maximum(Z, 0.0)


if __name__ == "__main__":
    # Shapes implied by the forward: X [batch, N, in_features], A [N, N].
    batch, N, in_features, out_features = 2, 8, 16, 32

    key = jax.random.PRNGKey(0)
    k_x, k_a, k_w, k_b = jax.random.split(key, 4)

    X = jax.random.normal(k_x, (batch, N, in_features), dtype=jnp.float32)
    A = jax.random.uniform(k_a, (N, N), dtype=jnp.float32)  # non-negative adjacency

    # Deterministic fc (nn.Linear) params; W stored as [in_features, out_features].
    bound = 1.0 / (in_features ** 0.5)
    W = jax.random.uniform(k_w, (in_features, out_features),
                           minval=-bound, maxval=bound, dtype=jnp.float32)
    b = jax.random.uniform(k_b, (out_features,),
                           minval=-bound, maxval=bound, dtype=jnp.float32)

    out = jax.block_until_ready(lam_gconv(X, A, W, b))
    ref = lam_gconv_ref(X, A, W, b)

    assert out.shape == (batch, N, out_features)
    assert jnp.allclose(out, ref, atol=1e-4, rtol=1e-4), "mismatch vs reference"

    print("KERNEL_OK")
</pallas_src>

<mosaic_0001>
module attributes {stable_mosaic.version = 11 : i64} {
  func.func @lam_gconv_kernel(%arg0: i32, %arg1: memref<8x8xf32, #tpu.memory_space<vmem>>, %arg2: memref<2x8x16xf32, #tpu.memory_space<vmem>>, %arg3: memref<16x128xf32, #tpu.memory_space<vmem>>, %arg4: memref<1x128xf32, #tpu.memory_space<vmem>>, %arg5: memref<16x128xf32, #tpu.memory_space<vmem>>) attributes {dimension_semantics = [#tpu.dimension_semantics<parallel>], iteration_bounds = array<i64: 1>, scalar_prefetch = 0 : i64, scratch_operands = 0 : i64, tpu.core_type = #tpu.core_type<tc>, window_params = [{pipeline_mode = #tpu.pipeline_mode<synchronous>, transform_indices = @transform_0, window_bounds = array<i64: 8, 8>}, {transform_indices = @transform_1, window_bounds = array<i64: 2, 8, 16>}, {pipeline_mode = #tpu.pipeline_mode<synchronous>, transform_indices = @transform_2, window_bounds = array<i64: 16, 128>}, {pipeline_mode = #tpu.pipeline_mode<synchronous>, transform_indices = @transform_3, window_bounds = array<i64: 1, 128>}, {transform_indices = @transform_4, window_bounds = array<i64: 16, 128>}]} {
    %c0 = arith.constant 0 : index
    %c0_0 = arith.constant 0 : index
    %0 = vector.load %arg1[%c0, %c0_0] : memref<8x8xf32, #tpu.memory_space<vmem>>, vector<8x8xf32>
    %cst = arith.constant dense<0.000000e+00> : vector<8xf32>
    %1 = vector.multi_reduction <add>, %0, %cst [0] : vector<8x8xf32> to vector<8xf32>
    %2 = vector.shape_cast %1 : vector<8xf32> to vector<1x8xf32>
    %cst_1 = arith.constant 9.99999974E-6 : f32
    %3 = vector.broadcast %cst_1 : f32 to vector<1x8xf32>
    %4 = arith.addf %2, %3 : vector<1x8xf32>
    %5 = math.rsqrt %4 : vector<1x8xf32>
    %6 = tpu.transpose %5, [1, 0] : vector<1x8xf32> -> vector<8x1xf32>
    %7 = vector.broadcast %6 : vector<8x1xf32> to vector<8x8xf32>
    %8 = arith.mulf %7, %0 : vector<8x8xf32>
    %9 = vector.broadcast %5 : vector<1x8xf32> to vector<8x8xf32>
    %10 = arith.mulf %8, %9 : vector<8x8xf32>
    %c0_2 = arith.constant 0 : index
    %c0_3 = arith.constant 0 : index
    %c0_4 = arith.constant 0 : index
    %11 = vector.load %arg2[%c0_2, %c0_3, %c0_4] : memref<2x8x16xf32, #tpu.memory_space<vmem>>, vector<2x8x16xf32>
    %12 = vector.shape_cast %10 : vector<8x8xf32> to vector<1x8x8xf32>
    %13 = vector.broadcast %12 : vector<1x8x8xf32> to vector<2x8x8xf32>
    "tpu.trace_start"() <{level = 10 : i32, message = "bij,bjf->bif"}> : () -> ()
    %cst_5 = arith.constant dense<0.000000e+00> : vector<2x8x16xf32>
    %14 = tpu.matmul %13, %11, %cst_5 {dimension_numbers = #tpu.dot_dimension_numbers<[2], [1], [1], [2], [0, 0, 0, 1, 1, 2], [0], [0]>} : vector<2x8x8xf32>, vector<2x8x16xf32>, vector<2x8x16xf32> -> vector<2x8x16xf32>
    "tpu.trace_stop"() : () -> ()
    %15 = vector.shape_cast %14 : vector<2x8x16xf32> to vector<16x16xf32>
    %c0_6 = arith.constant 0 : index
    %c0_7 = arith.constant 0 : index
    %16 = vector.load %arg3[%c0_6, %c0_7] : memref<16x128xf32, #tpu.memory_space<vmem>>, vector<16x128xf32>
    %cst_8 = arith.constant dense<0.000000e+00> : vector<16x128xf32>
    %17 = tpu.matmul %15, %16, %cst_8 {dimension_numbers = #tpu.dot_dimension_numbers<[1], [0], [0], [1], [0, 0, 1, 1], [], []>} : vector<16x16xf32>, vector<16x128xf32>, vector<16x128xf32> -> vector<16x128xf32>
    %c0_9 = arith.constant 0 : index
    %c0_10 = arith.constant 0 : index
    %18 = vector.load %arg4[%c0_9, %c0_10] : memref<1x128xf32, #tpu.memory_space<vmem>>, vector<1x128xf32>
    %19 = vector.broadcast %18 : vector<1x128xf32> to vector<16x128xf32>
    %20 = arith.addf %17, %19 : vector<16x128xf32>
    %cst_11 = arith.constant 0.000000e+00 : f32
    %21 = vector.broadcast %cst_11 : f32 to vector<16x128xf32>
    %22 = arith.maximumf %20, %21 : vector<16x128xf32>
    %c0_12 = arith.constant 0 : index
    %c0_13 = arith.constant 0 : index
    %23 = vector.load %arg5[%c0_12, %c0_13] : memref<16x128xf32, #tpu.memory_space<vmem>>, vector<16x128xf32>
    tpu.vector_store %arg5[%c0_12, %c0_13], %22 {strides = array<i32>} : memref<16x128xf32, #tpu.memory_space<vmem>>, vector<16x128xf32>,
    return
  }
  func.func @transform_0(%arg0: i32) -> (i32, i32) {
    %c0_i32 = arith.constant 0 : i32
    %c0_i32_0 = arith.constant 0 : i32
    %c0_i32_1 = arith.constant 0 : i32
    return %c0_i32, %c0_i32_0 : i32, i32
  }
  func.func @transform_1(%arg0: i32) -> (i32, i32, i32) {
    %c0_i32 = arith.constant 0 : i32
    %c0_i32_0 = arith.constant 0 : i32
    %c0_i32_1 = arith.constant 0 : i32
    return %arg0, %c0_i32, %c0_i32_0 : i32, i32, i32
  }
  func.func @transform_2(%arg0: i32) -> (i32, i32) {
    %c0_i32 = arith.constant 0 : i32
    %c0_i32_0 = arith.constant 0 : i32
    %c0_i32_1 = arith.constant 0 : i32
    return %c0_i32, %c0_i32_0 : i32, i32
  }
  func.func @transform_3(%arg0: i32) -> (i32, i32) {
    %c0_i32 = arith.constant 0 : i32
    %c0_i32_0 = arith.constant 0 : i32
    %c0_i32_1 = arith.constant 0 : i32
    return %c0_i32, %c0_i32_0 : i32, i32
  }
  func.func @transform_4(%arg0: i32) -> (i32, i32) {
    %c0_i32 = arith.constant 0 : i32
    %c0_i32_0 = arith.constant 0 : i32
    return %arg0, %c0_i32 : i32, i32
  }
}

</mosaic_0001>

<bundles_post_ra>
// kernel: tpu_custom_call.1
= control target key start
LH: loop header
LB: loop body
LE: loop exit
PB: predicated region body
PF: predicated region fallthrough
CT: control target
= control target key end

     0   :  { %9 = vsyncpa [#allocation3], 0  ;;  %s602_s0 = inlined_call_operand.hbm [shape: f32[8,8], index: 0, kind: input, shape index: {}]   ;;  %s603_s1 = inlined_call_operand.hbm [shape: f32[2,8,16], index: 1, kind: input, shape index: {}]   ;;  %s604_s2 = inlined_call_operand.hbm [shape: f32[16,128], index: 2, kind: input, shape index: {}]   ;;  %s605_s3 = inlined_call_operand.vmem [shape: f32[1,128], index: 3, kind: input, shape index: {}]   ;;  %s606_s4 = inlined_call_operand.hbm [shape: f32[16,128], index: 4, kind: output, shape index: {}]  }
   0x1   :  { %10 = vsyncpa [#allocation6], 0 }
   0x2   :  { %11 = vsyncpa [#allocation4], 0  ;;  %s505_s15 = smov [#allocation5]   ;;  %s411_s19 = scalar_lea.hbm %s603_s1, 256 }
   0x3   :  { %s27_s16 = sshll.u32 %s505_s15, 4  ;;  %p412_p0 = scmp.ne.s32.totalorder %s603_s1, %s411_s19  ;;  %s28_s16 = int_to_ptr.vmem [resolvable:$true] %s27_s16 }
   0x4   :  { %p415_p1 = scmp.lt.u32.totalorder %s411_s19, %s603_s1 }
   0x6   :  { %p417_p2 = pnand %p415_p1, %p412_p0 }
   0x8   :  { %420 = shalt.err (!%p417_p2)
}
   0x9   :  { %s421_s24 = scalar_lea.vmem %s28_s16, 256  ;;  %p426_p4 = scmp.lt.s32.totalorder %s28_s16, %s28_s16 }
   0xa   :  { %p422_p3 = scmp.ne.s32.totalorder %s28_s16, %s421_s24  ;;  %p427_p5 = scmp.lt.s32.totalorder %s421_s24, %s421_s24 }
   0xc   :  { %p428_p6 = por %p427_p5, %p426_p4 }
   0xe   :  { %p429_p7 = pnand %p428_p6, %p422_p3 }
  0x10   :  { %432 = shalt.err (!%p429_p7)
}
  0x11   :  { %s506_s25 = smov 128   ;;  %s507_s26 = smov 8  }
  0x12   :  { %33 = dma.hbm_to_vmem [thread:$0]  %s603_s1, 256, %s28_s16, [#allocation6], %s506_s25, %s506_s25, %s507_s26  }
  0x13   :  { %s508_s29 = smov [#allocation2]   ;;  %s509_s5 = smov [#allocation7]  }
  0x14   :  { %s18_s30 = sshll.u32 %s508_s29, 4  ;;  %s39_s6 = sshll.u32 %s509_s5, 4  ;;  %s19_s30 = int_to_ptr.vmem [resolvable:$true] %s18_s30  ;;  %s40_s6 = int_to_ptr.vmem [resolvable:$true] %s39_s6 }
  0x15   :  { %s433_s9 = scalar_lea.hbm %s602_s0, 128 }
  0x16   :  { %p434_p8 = scmp.ne.s32.totalorder %s602_s0, %s433_s9  ;;  %p437_p9 = scmp.lt.u32.totalorder %s433_s9, %s602_s0 }
  0x18   :  { %p439_p10 = pnand %p437_p9, %p434_p8 }
  0x1a   :  { %442 = shalt.err (!%p439_p10)
}
  0x1b   :  { %s443_s1 = scalar_lea.vmem %s19_s30, 128  ;;  %p448_p12 = scmp.lt.s32.totalorder %s19_s30, %s19_s30 }
  0x1c   :  { %p444_p11 = scmp.ne.s32.totalorder %s19_s30, %s443_s1  ;;  %p449_p13 = scmp.lt.s32.totalorder %s443_s1, %s443_s1 }
  0x1e   :  { %p450_p0 = por %p449_p13, %p448_p12 }
  0x20   :  { %p451_p1 = pnand %p450_p0, %p444_p11 }
  0x22   :  { %454 = shalt.err (!%p451_p1)
}
  0x23   :  { %21 = dma.hbm_to_vmem [thread:$0]  %s602_s0, 128, %s19_s30, [#allocation3]  }
  0x24   :  { %s455_s18 = scalar_lea.hbm %s604_s2, 256 }
  0x25   :  { %p456_p2 = scmp.ne.s32.totalorder %s604_s2, %s455_s18  ;;  %p459_p3 = scmp.lt.u32.totalorder %s455_s18, %s604_s2 }
  0x27   :  { %p461_p4 = pnand %p459_p3, %p456_p2 }
  0x29   :  { %464 = shalt.err (!%p461_p4)
}
  0x2a   :  { %s465_s23 = scalar_lea.vmem %s40_s6, 256  ;;  %p470_p6 = scmp.lt.s32.totalorder %s40_s6, %s40_s6 }
  0x2b   :  { %p466_p5 = scmp.ne.s32.totalorder %s40_s6, %s465_s23  ;;  %p471_p7 = scmp.lt.s32.totalorder %s465_s23, %s465_s23 }
  0x2d   :  { %p472_p8 = por %p471_p7, %p470_p6 }
  0x2f   :  { %p473_p9 = pnand %p472_p8, %p466_p5 }
  0x31   :  { %476 = shalt.err (!%p473_p9)
}
  0x32   :  { %45 = dma.hbm_to_vmem [thread:$0]  %s604_s2, 256, %s40_s6, [#allocation6], %s506_s25, %s506_s25, %s507_s26  }
  0x33   :  { %499 = dma.done.wait [#allocation3], 128  }
  0x34   :  { %500 = vsyncadd [#allocation3], 4294967168 }
  0x35   :  { %501 = dma.done.wait [#allocation6], 512  }
  0x36   :  { %502 = vsyncadd [#allocation6], 4294966784  ;;  %vm58_vm0 = vcmask 64512   ;;  %v57_v0 = vld [vmem:[#allocation2] sm:$0xff]  ;;  %v510_v10 = vmov 0   ;;  %v511_v12 = vmov 0.0  }
  0x37   :  { %v59_v1 = vsel %vm58_vm0, %v57_v0, 0.0  ;;  %378 = vmatprep.subr.mxu0 %v511_v12  ;;  %383 = vmatprep.subr.mxu1 %v511_v12  ;;  %v107_v13 = vld [vmem:[#allocation5] sm:$0xff]  ;;  %v108_v14 = vld [vmem:[#allocation5 + $0x8] sm:$0xff]  ;;  %vm512_vm1 = vmmov 0   ;;  %v252_v15 = vld [vmem:[#allocation7] sm:$0xff]  ;;  %vm261_vm2 = vcmask 130048  }
  0x38   :  { %v60_v2 = vrot.slane %v59_v1, 4  ;;  %379 = vmatpush3.msra.mxu0 %v107_v13  ;;  %380 = vmatprep.mubr.msk.f32.mxu0 %vm512_vm1, %v511_v12  ;;  %v253_v16 = vld [vmem:[#allocation7 + $0x8] sm:$0xff]  ;;  %s513_s28 = smov [#allocation8]  }
  0x39   :  { %384 = vmatpush3.msra.mxu1 %v108_v14  ;;  %385 = vmatprep.mubr.msk.f32.mxu1 %vm512_vm1, %v511_v12  ;;  %v395_v17 = vpack.c.bf16 %v253_v16, %v252_v15  ;;  %v367_v25 = vld [vmem:[%s605_s3] ss:$0 sm:$0xff]  ;;  %s352_s29 = sshll.u32 %s513_s28, 4  ;;  %s353_s29 = int_to_ptr.vmem [resolvable:$true] %s352_s29 }
  0x3a   :  { %v61_v3 = vadd.f32 %v60_v2, %v59_v1  ;;  %s477_s30 = scalar_lea.vmem %s353_s29, 256  ;;  %p482_p11 = scmp.lt.s32.totalorder %s353_s29, %s353_s29 }
  0x3b   :  { %396 = vmatprep.subr.bf16.mxu0 %v395_v17  ;;  %p478_p10 = scmp.ne.s32.totalorder %s353_s29, %s477_s30  ;;  %p483_p12 = scmp.lt.s32.totalorder %s477_s30, %s477_s30 }
  0x3c   :  { %v62_v4 = vrot.slane %v61_v3, 2 }
  0x3d   :  { %p484_p13 = por %p483_p12, %p482_p11 }
  0x3e   :  { %v63_v5 = vadd.f32 %v62_v4, %v61_v3 }
  0x3f   :  { %p485_p0 = pnand %p484_p13, %p478_p10 }
  0x40   :  { %v64_v6 = vrot.slane %v63_v5, 1 }
  0x42   :  { %v65_v7 = vadd.f32 %v64_v6, %v63_v5 }
  0x44   :  { %v66_v8 = vadd.f32 1e-05, %v65_v7 }
  0x46   :  { %409 = vrsqrt.f32 %v66_v8 }
  0x50   :  { %v410_v9 = vpop.eup %409 }
  0x51   :  { %68 = vxpose.xlu0.b32.start.end [1/1] (short) (narrow) %v410_v9, 8 }
  0x7a   :  { %408 = vset.pattern.permute.xlu0 %v510_v10 }
  0xd1   :  { %v84_v11 = vpop.trf.xlu0 }
  0xd2   :  { %102 = vperm.xlu0 %408, %v84_v11  }
 0x151   :  { %v103_v18 = vpop.permute.xlu0 %102 }
 0x152   :  { %v105_v19 = vmul.f32 %v103_v18, %v57_v0 }
 0x154   :  { %v106_v20 = vmul.f32 %v410_v9, %v105_v19 }
 0x156   :  { %381 = vmatmul.mubr.msk.f32.vlgmr.msra.gmra.mrb[0].mxu0 %vm58_vm0, %v106_v20  ;;  %386 = vmatmul.mubr.msk.f32.vlgmr.msra.gmra.mrb[0].mxu1 %vm58_vm0, %v106_v20 }
 0x157   :  { %398 = vmatpush3.bf16.msra.mxu0 %v395_v17 }
 0x229   :  { %v178_v21 = vpop.f32.mrb[0].mxu0  ;;  %v248_v22 = vpop.f32.mrb[0].mxu1 }
 0x22a   :  { %v382_v23 = vpop.f32.mrb[1].mxu0  ;;  %v387_v24 = vpop.f32.mrb[1].mxu1  ;;  %392 = vmatprep.mubr.msk.f32.mxu0 %vm261_vm2, %v178_v21 }
 0x22b   :  { %393 = vmatmul.mubr.msk.f32.vlgmr.msra.gmra.mrb[2].mxu0 %vm261_vm2, %v248_v22 }
 0x2fe   :  { %v394_v26 = vpop.f32.mrb[2].mxu0 }
 0x2ff   :  { %v340_v27 = vadd.f32 %v394_v26, %v367_v25  ;;  %v334_v28 = vpop.f32.mrb[3].mxu0 }
 0x300   :  { %v335_v29 = vadd.f32 %v367_v25, %v334_v28 }
 0x301   :  { %v344_v30 = vmax.f32 %v340_v27, 0.0 }
 0x302   :  { %v343_v31 = vmax.f32 %v335_v29, 0.0 }
 0x303   :  { %346 = vst [vmem:[#allocation8 + $0x8] sm:$0xff] %v344_v30 }
 0x304   :  { %345 = vst [vmem:[#allocation8] sm:$0xff] %v343_v31 }
 0x305   :  { %488 = shalt.err (!%p485_p0)
}
 0x306   :  { %s489_s6 = scalar_lea.hbm %s606_s4, 256 }
 0x307   :  { %p490_p1 = scmp.ne.s32.totalorder %s606_s4, %s489_s6  ;;  %p493_p2 = scmp.lt.u32.totalorder %s489_s6, %s606_s4 }
 0x309   :  { %p495_p3 = pnand %p493_p2, %p490_p1 }
 0x30b   :  { %498 = shalt.err (!%p495_p3)
}
 0x30c   :  { %358 = dma.vmem_to_hbm [thread:$0]  %s353_s29, 256, %s606_s4, [#allocation4], %s506_s25, %s506_s25, %s507_s26  }
 0x30d   :  { %503 = dma.done.wait [#allocation4], 256  }
 0x30e   :  { %504 = vsyncadd [#allocation4], 4294967040 }
 0x30f   :  { %362 = vsyncpa [#allocation3], 1 }
 0x310   :  { %363 = vsyncpa [#allocation6], 1 }
 0x311   :  { %364 = vsyncpa [#allocation4], 1 }

</bundles_post_ra>
